<compile_context>
chip_gen: v7x
topology: tpu7x:2x2x1
jax: 0.10.0
libtpu: 0.0.40
codegen_flags: <defaults>
</compile_context>

<pallas_src>
from functools import partial

import numpy as np
import jax
import jax.numpy as jnp
from jax.experimental import pallas as pl
from jax.experimental.pallas import tpu as pltpu


# ----------------------------- noise scheduler (glue) -----------------------------

def cosine_beta_schedule(timesteps, s=0.008):
    steps = timesteps + 1
    x = np.linspace(0, timesteps, steps, dtype=np.float64)
    alphas_cumprod = np.cos(((x / timesteps) + s) / (1 + s) * np.pi * 0.5) ** 2
    alphas_cumprod = alphas_cumprod / alphas_cumprod[0]
    betas = 1 - (alphas_cumprod[1:] / alphas_cumprod[:-1])
    return np.clip(betas, 0, 0.999)


def sinusoidal_time_emb(t, dim):
    # Part of the synthetic prior net's conditioning (real net is external).
    half = dim // 2
    freqs = jnp.exp(-jnp.log(10000.0) * jnp.arange(half, dtype=jnp.float32) / (half - 1))
    args = t.astype(jnp.float32)[:, None] * freqs[None, :]
    return jnp.concatenate([jnp.sin(args), jnp.cos(args)], axis=-1)


def _round_up(x, m):
    return ((x + m - 1) // m) * m


# --------------------------------- Pallas kernel -----------------------------------

def prior_loss_kernel(packed_ref, w1_ref, b1_ref, w2_ref, b2_ref,
                      pred_ref, losspart_ref, *, emb_dim, valid_rows, tile_rows):
    x = packed_ref[...]                                      # [tB, Kp] lane-dense

    # ---- synthetic prior net: two small MXU matmuls (K = Kp = 128, all real data)
    h = jnp.dot(x, w1_ref[...], preferred_element_type=jnp.float32) + b1_ref[...]
    h = h * jax.nn.sigmoid(h)                                # SiLU (sigmoid -> EUP)
    pred = jnp.dot(h, w2_ref[...], preferred_element_type=jnp.float32) + b2_ref[...]
    pred_ref[...] = pred                                     # lane-dense [tB, Dp]

    # ---- predict_x_start=True -> target is the scaled mol_embed, carried in
    # lanes [0, emb_dim) of the packed input; zero the other lane groups.
    dp = pred.shape[1]
    lane = jax.lax.broadcasted_iota(jnp.int32, (tile_rows, dp), 1)
    target = jnp.where(lane < emb_dim, x[:, :dp], 0.0)       # [tB, Dp]

    diff = pred - target
    sq = diff * diff
    if valid_rows % tile_rows != 0:                          # mask padded batch rows
        row = (jax.lax.broadcasted_iota(jnp.int32, sq.shape, 0)
               + pl.program_id(0) * tile_rows)
        sq = jnp.where(row < valid_rows, sq, 0.0)
    # per-lane partial sums (sublane reduce only); mean finished in the wrapper
    losspart_ref[...] = jnp.sum(sq, axis=0, keepdims=True)   # [1, Dp]


# --------------------------------- wrapper ------------------------------------------

def diffusion_prior_forward(mol_embed, morpho_embed, times, noise, params,
                            sqrt_acp, sqrt_1m_acp, mol_embed_scale):
    B, D = mol_embed.shape
    H = params["w1x"].shape[1]
    f32 = jnp.float32

    # lane-dense padded sizes
    Dp = _round_up(D, 128)
    Hp = _round_up(H, 256) if H >= 256 else _round_up(H, 128)  # 256x256 MXU on v6e/v7x
    Kp = _round_up(4 * D, 128)            # packed conditioning width (4*32 = 128 exactly)

    # batch tiling: large tiles pipeline well (block >= 512 ~ 85% of HBM roofline),
    # but for B >= 16 pick a tile so the grid has >= 2 steps -> the "parallel" axis
    # shards across v7x's two TensorCores. (No effect on v5e/v6e: 1 TC/chip.)
    tile_b = _round_up(B, 8)
    if B >= 16:
        tile_b = _round_up((B + 1) // 2, 8)
    tile_b = min(tile_b, 512)
    Bp = _round_up(B, tile_b)
    n_tiles = Bp // tile_b

    # ---------------- tiny XLA-side preprocessing (all fused under jit) -------------
    # schedule gather (replaces the old in-kernel [tile_b, 1024] one-hot lookup)
    sa = sqrt_acp[times][:, None].astype(f32)                # sqrt(alphas_cumprod[t])
    sb = sqrt_1m_acp[times][:, None].astype(f32)             # sqrt(1 - alphas_cumprod[t])
    x_start = mol_embed.astype(f32) * mol_embed_scale        # scaled embed == L2 target
    x_noisy = sa * x_start + sb * noise.astype(f32)          # q_sample
    temb = sinusoidal_time_emb(times, D)                     # conditioning (synthetic net)

    # ONE lane-dense packed conditioning array: [x_start | x_noisy | temb | morpho]
    packed = jnp.concatenate(
        [x_start, x_noisy, temb, morpho_embed.astype(f32)], axis=-1)      # [B, 4D]
    packed = jnp.pad(packed, ((0, Bp - B), (0, Kp - 4 * D)))

    def pad2(a, r, c):
        return jnp.pad(a.astype(f32), ((0, r - a.shape[0]), (0, c - a.shape[1])))

    # fused + lane-padded first-layer weights (one-time parameter transform in a real
    # training loop). Rows [0, D) are zero so the x_start lanes do not feed the net.
    w1 = jnp.zeros((Kp, Hp), f32)
    w1 = w1.at[D:2 * D, :H].set(params["w1x"].astype(f32))
    w1 = w1.at[2 * D:3 * D, :H].set(params["w1t"].astype(f32))
    w1 = w1.at[3 * D:4 * D, :H].set(params["w1m"].astype(f32))
    b1 = pad2(params["b1"], 1, Hp)
    w2 = pad2(params["w2"], Hp, Dp)
    b2 = pad2(params["b2"], 1, Dp)

    row_spec = pl.BlockSpec((tile_b, Kp), lambda i: (i, 0))

    def const_spec(shape):
        return pl.BlockSpec(shape, lambda i, _n=len(shape): (0,) * _n)
    # TODO(synk): mark const specs pipeline_mode=pl.Buffered(1) + set vmem_limit_bytes
    # once the real DiffusionPriorNetwork replaces the synthetic MLP (resident-weight
    # footprint matters on v7x's 64 MiB VMEM; irrelevant at the ~130 KB here).

    kernel = partial(prior_loss_kernel, emb_dim=D, valid_rows=B, tile_rows=tile_b)

    flops = 2 * Bp * Kp * Hp + 2 * Bp * Hp * Dp
    bytes_accessed = 4 * (Bp * Kp + Kp * Hp + Hp + Hp * Dp + Dp
                          + Bp * Dp + n_tiles * Dp)
    cost = pl.CostEstimate(flops=flops, transcendentals=Bp * Hp,
                           bytes_accessed=bytes_accessed)

    pred_p, loss_parts = pl.pallas_call(
        kernel,
        out_shape=(jax.ShapeDtypeStruct((Bp, Dp), f32),
                   jax.ShapeDtypeStruct((1, n_tiles * Dp), f32)),
        grid_spec=pltpu.PrefetchScalarGridSpec(
            num_scalar_prefetch=0,
            grid=(n_tiles,),
            in_specs=[row_spec,
                      const_spec((Kp, Hp)), const_spec((1, Hp)),
                      const_spec((Hp, Dp)), const_spec((1, Dp))],
            out_specs=(pl.BlockSpec((tile_b, Dp), lambda i: (i, 0)),
                       pl.BlockSpec((1, Dp), lambda i: (0, i))),
        ),
        compiler_params=pltpu.CompilerParams(
            dimension_semantics=("parallel",)),
        cost_estimate=cost,
    )(packed, w1, b1, w2, b2)

    loss = jnp.sum(loss_parts) / (B * D)
    # padded pred returned as-is; any slicing is deferred outside the jitted program
    return loss, pred_p


# ------------------------------------- main -----------------------------------------

if __name__ == "__main__":
    B, D, H = 8, 32, 64
    TIMESTEPS = 1000
    mol_embed_scale = float(D) ** 0.5

    key = jax.random.PRNGKey(0)
    keys = jax.random.split(key, 10)

    # inputs (mol_embed / morpho_embed supplied directly, as the module allows)
    mol_embed = jax.random.normal(keys[0], (B, D), dtype=jnp.float32)
    morpho_embed = jax.random.normal(keys[1], (B, D), dtype=jnp.float32)
    noise = jax.random.normal(keys[2], (B, D), dtype=jnp.float32)
    times = jax.random.randint(keys[3], (B,), 0, TIMESTEPS)

    # deterministic synthetic prior-net parameters
    params = {
        "w1x": 0.02 * jax.random.normal(keys[4], (D, H), dtype=jnp.float32),
        "w1t": 0.02 * jax.random.normal(keys[5], (D, H), dtype=jnp.float32),
        "w1m": 0.02 * jax.random.normal(keys[6], (D, H), dtype=jnp.float32),
        "b1":  jnp.zeros((1, H), dtype=jnp.float32),
        "w2":  0.02 * jax.random.normal(keys[7], (H, D), dtype=jnp.float32),
        "b2":  jnp.zeros((1, D), dtype=jnp.float32),
    }

    # cosine noise schedule buffers
    betas = cosine_beta_schedule(TIMESTEPS)
    alphas_cumprod = np.cumprod(1.0 - betas)
    sqrt_acp = jnp.asarray(np.sqrt(alphas_cumprod), dtype=jnp.float32)
    sqrt_1m_acp = jnp.asarray(np.sqrt(1.0 - alphas_cumprod), dtype=jnp.float32)

    # jit the whole forward so gather / packing / time-emb / pallas_call compile
    # into a single XLA program (no per-op launch overhead around the kernel)
    forward = jax.jit(diffusion_prior_forward, static_argnames=("mol_embed_scale",))
    loss, pred_p = forward(mol_embed, morpho_embed, times, noise, params,
                           sqrt_acp, sqrt_1m_acp, mol_embed_scale=mol_embed_scale)
    jax.block_until_ready((loss, pred_p))
    pred = pred_p[:B, :D]

    # pure-JAX reference check
    x_start = mol_embed * mol_embed_scale
    temb = sinusoidal_time_emb(times, D)
    x_noisy = sqrt_acp[times][:, None] * x_start + sqrt_1m_acp[times][:, None] * noise
    h_ref = (x_noisy @ params["w1x"] + temb @ params["w1t"]
             + morpho_embed @ params["w1m"] + params["b1"])
    h_ref = h_ref * jax.nn.sigmoid(h_ref)
    pred_ref = h_ref @ params["w2"] + params["b2"]
    loss_ref = jnp.mean((pred_ref - x_start) ** 2)

    assert jnp.allclose(pred, pred_ref, atol=1e-4, rtol=1e-4)
    assert jnp.allclose(loss, loss_ref, atol=1e-5, rtol=1e-4)
    print("KERNEL_OK")
</pallas_src>

<mosaic_0001>
module attributes {stable_mosaic.version = 11 : i64} {
  func.func @prior_loss_kernel(%arg0: i32, %arg1: memref<8x128xf32, #tpu.memory_space<vmem>>, %arg2: memref<128x128xf32, #tpu.memory_space<vmem>>, %arg3: memref<1x128xf32, #tpu.memory_space<vmem>>, %arg4: memref<128x128xf32, #tpu.memory_space<vmem>>, %arg5: memref<1x128xf32, #tpu.memory_space<vmem>>, %arg6: memref<8x128xf32, #tpu.memory_space<vmem>>, %arg7: memref<1x128xf32, #tpu.memory_space<vmem>>) attributes {dimension_semantics = [#tpu.dimension_semantics<parallel>], iteration_bounds = array<i64: 1>, scalar_prefetch = 0 : i64, scratch_operands = 0 : i64, tpu.core_type = #tpu.core_type<tc>, window_params = [{transform_indices = @transform_0, window_bounds = array<i64: 8, 128>}, {pipeline_mode = #tpu.pipeline_mode<synchronous>, transform_indices = @transform_1, window_bounds = array<i64: 128, 128>}, {pipeline_mode = #tpu.pipeline_mode<synchronous>, transform_indices = @transform_2, window_bounds = array<i64: 1, 128>}, {pipeline_mode = #tpu.pipeline_mode<synchronous>, transform_indices = @transform_3, window_bounds = array<i64: 128, 128>}, {pipeline_mode = #tpu.pipeline_mode<synchronous>, transform_indices = @transform_4, window_bounds = array<i64: 1, 128>}, {transform_indices = @transform_5, window_bounds = array<i64: 8, 128>}, {transform_indices = @transform_6, window_bounds = array<i64: 1, 128>}]} {
    %c0 = arith.constant 0 : index
    %c0_0 = arith.constant 0 : index
    %0 = vector.load %arg1[%c0, %c0_0] : memref<8x128xf32, #tpu.memory_space<vmem>>, vector<8x128xf32>
    %c0_1 = arith.constant 0 : index
    %c0_2 = arith.constant 0 : index
    %1 = vector.load %arg2[%c0_1, %c0_2] : memref<128x128xf32, #tpu.memory_space<vmem>>, vector<128x128xf32>
    %cst = arith.constant dense<0.000000e+00> : vector<8x128xf32>
    %2 = tpu.matmul %0, %1, %cst {dimension_numbers = #tpu.dot_dimension_numbers<[1], [0], [0], [1], [0, 0, 1, 1], [], []>} : vector<8x128xf32>, vector<128x128xf32>, vector<8x128xf32> -> vector<8x128xf32>
    %c0_3 = arith.constant 0 : index
    %c0_4 = arith.constant 0 : index
    %3 = vector.load %arg3[%c0_3, %c0_4] : memref<1x128xf32, #tpu.memory_space<vmem>>, vector<1x128xf32>
    %4 = vector.broadcast %3 : vector<1x128xf32> to vector<8x128xf32>
    %5 = arith.addf %2, %4 : vector<8x128xf32>
    %6 = arith.negf %5 : vector<8x128xf32>
    %7 = math.exp %6 : vector<8x128xf32>
    %cst_5 = arith.constant 1.000000e+00 : f32
    %8 = vector.broadcast %cst_5 : f32 to vector<8x128xf32>
    %9 = arith.addf %8, %7 : vector<8x128xf32>
    %10 = arith.divf %8, %9 : vector<8x128xf32>
    %11 = arith.mulf %5, %10 : vector<8x128xf32>
    %c0_6 = arith.constant 0 : index
    %c0_7 = arith.constant 0 : index
    %12 = vector.load %arg4[%c0_6, %c0_7] : memref<128x128xf32, #tpu.memory_space<vmem>>, vector<128x128xf32>
    %cst_8 = arith.constant dense<0.000000e+00> : vector<8x128xf32>
    %13 = tpu.matmul %11, %12, %cst_8 {dimension_numbers = #tpu.dot_dimension_numbers<[1], [0], [0], [1], [0, 0, 1, 1], [], []>} : vector<8x128xf32>, vector<128x128xf32>, vector<8x128xf32> -> vector<8x128xf32>
    %c0_9 = arith.constant 0 : index
    %c0_10 = arith.constant 0 : index
    %14 = vector.load %arg5[%c0_9, %c0_10] : memref<1x128xf32, #tpu.memory_space<vmem>>, vector<1x128xf32>
    %15 = vector.broadcast %14 : vector<1x128xf32> to vector<8x128xf32>
    %16 = arith.addf %13, %15 : vector<8x128xf32>
    %c0_11 = arith.constant 0 : index
    %c0_12 = arith.constant 0 : index
    %17 = vector.load %arg6[%c0_11, %c0_12] : memref<8x128xf32, #tpu.memory_space<vmem>>, vector<8x128xf32>
    tpu.vector_store %arg6[%c0_11, %c0_12], %16 {strides = array<i32>} : memref<8x128xf32, #tpu.memory_space<vmem>>, vector<8x128xf32>,
    %18 = tpu.iota {dimensions = array<i32: 1>} : vector<8x128xi32>
    %c32_i32 = arith.constant 32 : i32
    %19 = vector.broadcast %c32_i32 : i32 to vector<8x128xi32>
    %20 = arith.cmpi slt, %18, %19 : vector<8x128xi32>
    %cst_13 = arith.constant 0.000000e+00 : f32
    %21 = vector.broadcast %cst_13 : f32 to vector<8x128xf32>
    %22 = arith.select %20, %0, %21 : vector<8x128xi1>, vector<8x128xf32>
    %23 = arith.subf %16, %22 : vector<8x128xf32>
    %24 = arith.mulf %23, %23 : vector<8x128xf32>
    %cst_14 = arith.constant dense<0.000000e+00> : vector<128xf32>
    %25 = vector.multi_reduction <add>, %24, %cst_14 [0] : vector<8x128xf32> to vector<128xf32>
    %26 = vector.shape_cast %25 : vector<128xf32> to vector<1x128xf32>
    %c0_15 = arith.constant 0 : index
    %c0_16 = arith.constant 0 : index
    %27 = vector.load %arg7[%c0_15, %c0_16] : memref<1x128xf32, #tpu.memory_space<vmem>>, vector<1x128xf32>
    tpu.vector_store %arg7[%c0_15, %c0_16], %26 {strides = array<i32>} : memref<1x128xf32, #tpu.memory_space<vmem>>, vector<1x128xf32>,
    return
  }
  func.func @transform_0(%arg0: i32) -> (i32, i32) {
    %c0_i32 = arith.constant 0 : i32
    %c0_i32_0 = arith.constant 0 : i32
    return %arg0, %c0_i32 : i32, i32
  }
  func.func @transform_1(%arg0: i32) -> (i32, i32) {
    %c0_i32 = arith.constant 0 : i32
    %c0_i32_0 = arith.constant 0 : i32
    %c0_i32_1 = arith.constant 0 : i32
    return %c0_i32, %c0_i32_0 : i32, i32
  }
  func.func @transform_2(%arg0: i32) -> (i32, i32) {
    %c0_i32 = arith.constant 0 : i32
    %c0_i32_0 = arith.constant 0 : i32
    %c0_i32_1 = arith.constant 0 : i32
    return %c0_i32, %c0_i32_0 : i32, i32
  }
  func.func @transform_3(%arg0: i32) -> (i32, i32) {
    %c0_i32 = arith.constant 0 : i32
    %c0_i32_0 = arith.constant 0 : i32
    %c0_i32_1 = arith.constant 0 : i32
    return %c0_i32, %c0_i32_0 : i32, i32
  }
  func.func @transform_4(%arg0: i32) -> (i32, i32) {
    %c0_i32 = arith.constant 0 : i32
    %c0_i32_0 = arith.constant 0 : i32
    %c0_i32_1 = arith.constant 0 : i32
    return %c0_i32, %c0_i32_0 : i32, i32
  }
  func.func @transform_5(%arg0: i32) -> (i32, i32) {
    %c0_i32 = arith.constant 0 : i32
    %c0_i32_0 = arith.constant 0 : i32
    return %arg0, %c0_i32 : i32, i32
  }
  func.func @transform_6(%arg0: i32) -> (i32, i32) {
    %c0_i32 = arith.constant 0 : i32
    %c0_i32_0 = arith.constant 0 : i32
    return %c0_i32, %arg0 : i32, i32
  }
}

</mosaic_0001>

<bundles_post_ra>
// kernel: diffusion_prior_forward.1
= control target key start
LH: loop header
LB: loop body
LE: loop exit
PB: predicated region body
PF: predicated region fallthrough
CT: control target
= control target key end

     0   :  { %v436_v3 = vmov 0.0|0.0   ;;  %vm437_vm0 = vmmov 0   ;;  %v438_v6 = vmov 0.0   ;;  %s611_s0 = inlined_call_operand.vmem [shape: f32[8,128], index: 0, kind: input, shape index: {}]   ;;  %s612_s1 = inlined_call_operand.vmem [shape: f32[128,128], index: 1, kind: input, shape index: {}]   ;;  %s613_s2 = inlined_call_operand.vmem [shape: f32[1,128], index: 2, kind: input, shape index: {}]   ;;  %s614_s3 = inlined_call_operand.vmem [shape: f32[128,128], index: 3, kind: input, shape index: {}]   ;;  %s615_s4 = inlined_call_operand.vmem [shape: f32[1,128], index: 4, kind: input, shape index: {}]   ;;  %s616_s5 = inlined_call_operand.hbm [shape: f32[8,128], index: 5, kind: output, shape index: {0}]   ;;  %s617_s6 = inlined_call_operand.vmem [shape: f32[1,128], index: 6, kind: output, shape index: {1}]  }
   0x1   :  { %v24_v0 = vld [vmem:[%s612_s1] sm:$0xff]  ;;  %v25_v1 = vld [vmem:[%s612_s1 + $0x8] sm:$0xff]  ;;  %v26_v2 = vld [vmem:[%s612_s1 + $0x10] sm:$0xff]  ;;  %356 = vmatprep.subr.bf16.mxu0 %v436_v3  ;;  %318 = vmatprep.mubr.msk.f32.mxu0 %vm437_vm0, %v438_v6 }
   0x2   :  { %v357_v4 = vpack.c.bf16 %v25_v1, %v24_v0  ;;  %v27_v5 = vld [vmem:[%s612_s1 + $0x18] sm:$0xff]  ;;  %380 = vmatprep.subr.bf16.mxu1 %v436_v3  ;;  %353 = vmatprep.mubr.msk.f32.mxu1 %vm437_vm0, %v438_v6  ;;  %v28_v8 = vld [vmem:[%s612_s1 + $0x20] sm:$0xff]  ;;  %v29_v9 = vld [vmem:[%s612_s1 + $0x28] sm:$0xff] }
   0x3   :  { %v360_v7 = vpack.c.bf16 %v27_v5, %v26_v2 }
   0x4   :  { %358 = vmatpush3.bf16.msra.mxu0 %v357_v4 }
   0x5   :  { %359 = vmatprep.subr.bf16.mxu0 %v436_v3 }
   0x6   :  { %12 = vsyncpa [#allocation3], 0  ;;  %v363_v10 = vpack.c.bf16 %v29_v9, %v28_v8  ;;  %v30_v11 = vld [vmem:[%s612_s1 + $0x30] sm:$0xff]  ;;  %v31_v12 = vld [vmem:[%s612_s1 + $0x38] sm:$0xff]  ;;  %v218_v60 = vlaneseq  ;;  %s439_s14 = smov [#allocation2]  }
   0x7   :  { %v366_v13 = vpack.c.bf16 %v31_v12, %v30_v11  ;;  %v32_v14 = vld [vmem:[%s612_s1 + $0x40] sm:$0xff]  ;;  %v33_v15 = vld [vmem:[%s612_s1 + $0x48] sm:$0xff]  ;;  %v34_v17 = vld [vmem:[%s612_s1 + $0x50] sm:$0xff] }
   0x8   :  { %361 = vmatpush3.bf16.msra.mxu0 %v360_v7  ;;  %v369_v16 = vpack.c.bf16 %v33_v15, %v32_v14  ;;  %v35_v18 = vld [vmem:[%s612_s1 + $0x58] sm:$0xff]  ;;  %v36_v20 = vld [vmem:[%s612_s1 + $0x60] sm:$0xff]  ;;  %v37_v21 = vld [vmem:[%s612_s1 + $0x68] sm:$0xff]  ;;  %v219_v61 = vand.u32 127, %v218_v60 }
   0x9   :  { %362 = vmatprep.subr.bf16.mxu0 %v436_v3  ;;  %v372_v19 = vpack.c.bf16 %v35_v18, %v34_v17  ;;  %v375_v22 = vpack.c.bf16 %v37_v21, %v36_v20  ;;  %v38_v23 = vld [vmem:[%s612_s1 + $0x70] sm:$0xff]  ;;  %v39_v24 = vld [vmem:[%s612_s1 + $0x78] sm:$0xff]  ;;  %v23_v26 = vld [vmem:[%s611_s0] sm:$0xff] }
   0xa   :  { %v378_v25 = vpack.c.bf16 %v39_v24, %v38_v23  ;;  %v124_v27 = vld [vmem:[%s614_s3] sm:$0xff]  ;;  %v125_v28 = vld [vmem:[%s614_s3 + $0x8] sm:$0xff]  ;;  %v126_v30 = vld [vmem:[%s614_s3 + $0x10] sm:$0xff]  ;;  %vm220_vm1 = vcmp.lt.s32.totalorder %v219_v61, 32 }
   0xb   :  { %v381_v29 = vpack.c.bf16 %v125_v28, %v124_v27  ;;  %v127_v31 = vld [vmem:[%s614_s3 + $0x18] sm:$0xff]  ;;  %v128_v33 = vld [vmem:[%s614_s3 + $0x20] sm:$0xff]  ;;  %v129_v34 = vld [vmem:[%s614_s3 + $0x28] sm:$0xff]  ;;  %v221_v63 = vsel %vm220_vm1, %v23_v26, 0.0 }
   0xc   :  { %364 = vmatpush3.bf16.msra.mxu0 %v363_v10  ;;  %v384_v32 = vpack.c.bf16 %v127_v31, %v126_v30  ;;  %v387_v35 = vpack.c.bf16 %v129_v34, %v128_v33  ;;  %v130_v36 = vld [vmem:[%s614_s3 + $0x30] sm:$0xff]  ;;  %v131_v37 = vld [vmem:[%s614_s3 + $0x38] sm:$0xff]  ;;  %v132_v39 = vld [vmem:[%s614_s3 + $0x40] sm:$0xff] }
   0xd   :  { %365 = vmatprep.subr.bf16.mxu0 %v436_v3  ;;  %382 = vmatpush3.bf16.msra.mxu1 %v381_v29  ;;  %v390_v38 = vpack.c.bf16 %v131_v37, %v130_v36  ;;  %v133_v40 = vld [vmem:[%s614_s3 + $0x48] sm:$0xff]  ;;  %v134_v42 = vld [vmem:[%s614_s3 + $0x50] sm:$0xff]  ;;  %v135_v43 = vld [vmem:[%s614_s3 + $0x58] sm:$0xff] }
   0xe   :  { %383 = vmatprep.subr.bf16.mxu1 %v436_v3  ;;  %v393_v41 = vpack.c.bf16 %v133_v40, %v132_v39  ;;  %v396_v44 = vpack.c.bf16 %v135_v43, %v134_v42  ;;  %v136_v45 = vld [vmem:[%s614_s3 + $0x60] sm:$0xff]  ;;  %v137_v46 = vld [vmem:[%s614_s3 + $0x68] sm:$0xff]  ;;  %v138_v48 = vld [vmem:[%s614_s3 + $0x70] sm:$0xff] }
   0xf   :  { %v399_v47 = vpack.c.bf16 %v137_v46, %v136_v45  ;;  %v139_v49 = vld [vmem:[%s614_s3 + $0x78] sm:$0xff]  ;;  %v249_v51 = vld [vmem:[%s613_s2] ss:$0 sm:$0xff]  ;;  %s237_s2 = sshll.u32 %s439_s14, 4  ;;  %s238_s2 = int_to_ptr.vmem [resolvable:$true] %s237_s2 }
  0x10   :  { %367 = vmatpush3.bf16.msra.mxu0 %v366_v13  ;;  %v402_v50 = vpack.c.bf16 %v139_v49, %v138_v48  ;;  %v251_v62 = vld [vmem:[%s615_s4] ss:$0 sm:$0xff]  ;;  %s412_s15 = scalar_lea.vmem %s238_s2, 128  ;;  %p417_p1 = scmp.lt.s32.totalorder %s238_s2, %s238_s2 }
  0x11   :  { %368 = vmatprep.subr.bf16.mxu0 %v436_v3  ;;  %385 = vmatpush3.bf16.msra.mxu1 %v384_v32  ;;  %p413_p0 = scmp.ne.s32.totalorder %s238_s2, %s412_s15  ;;  %p418_p2 = scmp.lt.s32.totalorder %s412_s15, %s412_s15 }
  0x12   :  { %386 = vmatprep.subr.bf16.mxu1 %v436_v3 }
  0x13   :  { %p419_p3 = por %p418_p2, %p417_p1 }
  0x14   :  { %370 = vmatpush3.bf16.msra.mxu0 %v369_v16 }
  0x15   :  { %371 = vmatprep.subr.bf16.mxu0 %v436_v3  ;;  %388 = vmatpush3.bf16.msra.mxu1 %v387_v35  ;;  %p420_p4 = pnand %p419_p3, %p413_p0 }
  0x16   :  { %389 = vmatprep.subr.bf16.mxu1 %v436_v3 }
  0x18   :  { %373 = vmatpush3.bf16.msra.mxu0 %v372_v19 }
  0x19   :  { %374 = vmatprep.subr.bf16.mxu0 %v436_v3  ;;  %391 = vmatpush3.bf16.msra.mxu1 %v390_v38 }
  0x1a   :  { %392 = vmatprep.subr.bf16.mxu1 %v436_v3 }
  0x1c   :  { %376 = vmatpush3.bf16.msra.mxu0 %v375_v22 }
  0x1d   :  { %377 = vmatprep.subr.bf16.mxu0 %v436_v3  ;;  %394 = vmatpush3.bf16.msra.mxu1 %v393_v41 }
  0x1e   :  { %395 = vmatprep.subr.bf16.mxu1 %v436_v3 }
  0x20   :  { %379 = vmatpush3.bf16.msra.mxu0 %v378_v25 }
  0x21   :  { %397 = vmatpush3.bf16.msra.mxu1 %v396_v44 }
  0x22   :  { %398 = vmatprep.subr.bf16.mxu1 %v436_v3 }
  0x23   :  { %319 = vmatmul.mubr.f32.vlgmr.msra.gmra.mrb[0].mxu0 %v23_v26 }
  0x25   :  { %400 = vmatpush3.bf16.msra.mxu1 %v399_v47 }
  0x26   :  { %401 = vmatprep.subr.bf16.mxu1 %v436_v3 }
  0x29   :  { %403 = vmatpush3.bf16.msra.mxu1 %v402_v50 }
  0xf6   :  { %v113_v52 = vpop.f32.mrb[0].mxu0 }
  0xf7   :  { %v114_v53 = vadd.f32 %v249_v51, %v113_v52  ;;  %v320_v54 = vpop.f32.mrb[1].mxu0 }
  0xf9   :  { %v250_v55 = vmul.f32 -1.442695, %v114_v53 }
  0xfb   :  { %408 = vpow2.f32 %v250_v55 }
 0x105   :  { %v409_v56 = vpop.eup %408 }
 0x106   :  { %v120_v57 = vadd.f32 1.0, %v409_v56 }
 0x108   :  { %410 = vrcp.f32 %v120_v57 }
 0x112   :  { %v411_v58 = vpop.eup %410 }
 0x113   :  { %v123_v59 = vmul.f32 %v411_v58, %v114_v53 }
 0x115   :  { %354 = vmatmul.mubr.f32.vlgmr.msra.gmra.mrb[0].mxu1 %v123_v59 }
 0x1e8   :  { %v213_v0 = vpop.f32.mrb[0].mxu1 }
 0x1e9   :  { %v214_v1 = vadd.f32 %v251_v62, %v213_v0  ;;  %v355_v2 = vpop.f32.mrb[1].mxu1 }
 0x1eb   :  { %v222_v3 = vsub.f32 %v214_v1, %v221_v63  ;;  %217 = vst [vmem:[#allocation2] sm:$0xff] %v214_v1 }
 0x1ec   :  { %423 = shalt.err (!%p420_p4)
}
 0x1ed   :  { %s424_s4 = scalar_lea.hbm %s616_s5, 128 }
 0x1ee   :  { %p425_p5 = scmp.ne.s32.totalorder %s616_s5, %s424_s4  ;;  %p428_p6 = scmp.lt.u32.totalorder %s424_s4, %s616_s5 }
 0x1f0   :  { %p430_p7 = pnand %p428_p6, %p425_p5 }
 0x1f2   :  { %433 = shalt.err (!%p430_p7)
}
 0x1f3   :  { %240 = dma.vmem_to_hbm [thread:$0]  %s238_s2, 128, %s616_s5, [#allocation3]   ;;  %v223_v4 = vmul.f32 %v222_v3, %v222_v3 }
 0x1f5   :  { %v224_v5 = vrot.slane %v223_v4, 4 }
 0x1f7   :  { %v225_v6 = vadd.f32 %v224_v5, %v223_v4 }
 0x1f9   :  { %v226_v7 = vrot.slane %v225_v6, 2 }
 0x1fb   :  { %v227_v8 = vadd.f32 %v226_v7, %v225_v6 }
 0x1fd   :  { %v228_v9 = vrot.slane %v227_v8, 1 }
 0x1ff   :  { %v229_v10 = vadd.f32 %v228_v9, %v227_v8 }
 0x201   :  { %230 = vst [vmem:[%s617_s6] sm:$0x1] %v229_v10 }
 0x202   :  { %434 = dma.done.wait [#allocation3], 128  }
 0x203   :  { %435 = vsyncadd [#allocation3], 4294967168 }
 0x204   :  { %248 = vsyncpa [#allocation3], 1 }

</bundles_post_ra>
